<compile_context>
chip_gen: v7x
topology: tpu7x:2x2x1
jax: 0.10.0
libtpu: 0.0.40
codegen_flags: <defaults>
</compile_context>

<pallas_src>
import jax
import jax.numpy as jnp
from jax.experimental import pallas as pl
from jax.experimental.pallas import tpu as pltpu

EPS = 1e-5

# Problem sizes (small, consistent with the module's forward).
N = 16            # nodes
IN_DIM = 8
HID_DIM = 32
OUT_DIM = 4
NUM_GRAPHS = 2
NUM_CELLS = 4     # len(macro_architecture) + 1 with macro = [[1,1,1],[1,1],[1]]

F = 128           # lane-dense padded feature width (unmasked 128-wide stores)
K_PAD = 32        # padded contraction rows for every stacked weight
G_PAD = 8         # sublane-friendly padded graph count
NUM_W = 8         # pre_mlp(2) + cells(4) + post_mlp(2)
NUM_V = 16        # pre_mlp b(2) + cells b/gamma/beta(12) + post_mlp b(2)

# Static indices into the stacks:
#   weights: 0 pw1, 1 pw2, 2..5 cell W, 6 qw1, 7 qw2
#   vectors: 0 pb1, 1 pb2, [2+3c] cell bias, [3+3c] gamma, [4+3c] beta,
#            14 qb1, 15 qb2


# ------------------------------ fused kernel -------------------------------


def fused_forward_kernel(x_ref, adj_ref, pool_ref, w_ref, v_ref, o_ref):
    adj = adj_ref[...]                    # (N, N)   f32 normalized adjacency
    vecs = v_ref[...]                     # (16, F)  f32 biases/gammas/betas
    inv_h = 1.0 / HID_DIM

    def vec(k):                           # (1, F) row k of the vector stack
        return vecs[k:k + 1, :]

    def dot(a, b):                        # f32 operands, f32 accumulation
        return jnp.dot(a, b, preferred_element_type=jnp.float32)

    def mlp(h, wi, vi):
        # Linear -> ReLU -> Linear, weights {wi, wi+1}, biases {vi, vi+1}.
        z = jnp.maximum(dot(h[:, :K_PAD], w_ref[wi]) + vec(vi), 0.0)
        return dot(z[:, :K_PAD], w_ref[wi + 1]) + vec(vi + 1)

    def cell(h, wi, vi):
        # GCNConv: A_hat @ (H @ W) + b   (padded lanes of hh stay exactly 0).
        hh = dot(adj, dot(h[:, :K_PAD], w_ref[wi])) + vec(vi)
        # LayerNorm over the true HID_DIM features.  Padded lanes of hh are
        # exactly 0, so the unmasked sums only cover the 32 real features.
        mean = jnp.sum(hh, axis=-1, keepdims=True) * inv_h
        var = jnp.sum(hh * hh, axis=-1, keepdims=True) * inv_h - mean * mean
        hn = (hh - mean) * jax.lax.rsqrt(var + EPS)
        # gamma/beta are zero in padded lanes -> padded output lanes stay 0.
        return jnp.maximum(hn * vec(vi + 1) + vec(vi + 2), 0.0)

    h_pre = mlp(x_ref[...], 0, 0)         # pre_mlp
    h0 = cell(h_pre, 2, 2)                # cell 0
    h1 = cell(h0, 3, 5)                   # cell 1
    h01 = h0 + h1                         # hoisted & reused
    s = cell(h01, 4, 8)                   # cell 2
    l = cell(h01 + s, 5, 11)              # cell 3
    g_emb = dot(pool_ref[...], l)         # scatter_add pooling as one-hot matmul
    o_ref[...] = mlp(g_emb, 6, 14)        # post_mlp


# ------------------------------ host wrapper --------------------------------


def _pad2(a, rows, cols):
    out = jnp.zeros((rows, cols), jnp.float32)
    return out.at[: a.shape[0], : a.shape[1]].set(a.astype(jnp.float32))


def prepare_inputs(params, x, adj_hat, pool_mat):
    """One-time packing of the kernel's five inputs (hoisted out of forward)."""
    pw1, pb1, pw2, pb2 = params["pre_mlp"]
    qw1, qb1, qw2, qb2 = params["post_mlp"]
    weights = [pw1, pw2] + [c[0] for c in params["cells"]] + [qw1, qw2]
    vectors = [pb1, pb2]
    for (_, cb, cg, ct) in params["cells"]:
        vectors += [cb, cg, ct]
    vectors += [qb1, qb2]
    assert len(weights) == NUM_W and len(vectors) == NUM_V
    w_stack = jnp.stack([_pad2(w, K_PAD, F) for w in weights])            # (8,32,128)
    v_stack = jnp.concatenate([_pad2(v, 1, F) for v in vectors], axis=0)  # (16,128)
    x_pad = _pad2(x, N, F)                                                # (16,128)
    pool_pad = _pad2(pool_mat, G_PAD, N)                                  # (8,16)
    return x_pad, adj_hat.astype(jnp.float32), pool_pad, w_stack, v_stack


@jax.jit
def forward(x_pad, adj_hat, pool_pad, w_stack, v_stack):
    inputs = (x_pad, adj_hat, pool_pad, w_stack, v_stack)
    flops = (2 * (2 * N * K_PAD * F)                                   # pre_mlp
             + NUM_CELLS * (2 * N * K_PAD * F + 2 * N * N * F)         # cells
             + 2 * G_PAD * N * F                                       # pooling
             + 2 * (2 * G_PAD * K_PAD * F))                            # post_mlp
    bytes_accessed = sum(int(a.size) * 4 for a in inputs) + G_PAD * F * 4
    cost = pl.CostEstimate(flops=flops, transcendentals=NUM_CELLS * N,
                           bytes_accessed=bytes_accessed)
    out = pl.pallas_call(
        fused_forward_kernel,
        out_shape=jax.ShapeDtypeStruct((G_PAD, F), jnp.float32),
        in_specs=[pl.BlockSpec(memory_space=pltpu.MemorySpace.VMEM)
                  for _ in inputs],
        out_specs=pl.BlockSpec(memory_space=pltpu.MemorySpace.VMEM),
        cost_estimate=cost,
    )(*inputs)
    return out[:NUM_GRAPHS, :OUT_DIM]


# ------------------------------ params / graph -------------------------------


def init_params(key, in_dim, hid_dim, out_dim, num_cells):
    keys = jax.random.split(key, 4 + num_cells)

    def _lin(k, di, do):
        w = 0.1 * jax.random.normal(k, (di, do), jnp.float32)
        b = jnp.zeros((1, do), jnp.float32)
        return w, b

    pw1, pb1 = _lin(keys[0], in_dim, hid_dim)
    pw2, pb2 = _lin(keys[1], hid_dim, hid_dim)
    qw1, qb1 = _lin(keys[2], hid_dim, out_dim)
    qw2, qb2 = _lin(keys[3], out_dim, out_dim)
    cells = []
    for c in range(num_cells):
        cw, cb = _lin(keys[4 + c], hid_dim, hid_dim)
        cells.append((cw, cb, jnp.ones((1, hid_dim), jnp.float32),
                      jnp.zeros((1, hid_dim), jnp.float32)))
    return {"pre_mlp": (pw1, pb1, pw2, pb2),
            "post_mlp": (qw1, qb1, qw2, qb2),
            "cells": cells}


def build_adj_hat(edge_index, n):
    """Symmetric GCN normalization of A + I (host-side glue, built once)."""
    a = jnp.zeros((n, n), jnp.float32)
    a = a.at[edge_index[0], edge_index[1]].add(1.0)
    a = a + jnp.eye(n, dtype=jnp.float32)
    deg = jnp.sum(a, axis=1)
    dinv = jax.lax.rsqrt(deg)
    return a * dinv[:, None] * dinv[None, :]


# --------------------------- pure-JAX reference ------------------------------


def _ref_forward(params, x, adj_hat, pool_mat, *, bf16_dots=False):
    """Unpadded reference. Default: accurate f32 dots (PyTorch f32 fidelity)."""
    if bf16_dots:
        def dot(a, b):
            return jnp.dot(a.astype(jnp.bfloat16), b.astype(jnp.bfloat16),
                           preferred_element_type=jnp.float32)
    else:
        def dot(a, b):
            return jnp.dot(a, b, precision=jax.lax.Precision.HIGHEST)

    def ref_mlp(h, p):
        w1, b1, w2, b2 = p
        return dot(jnp.maximum(dot(h, w1) + b1, 0.0), w2) + b2

    def ref_cell(h, p):
        w, b, gamma, beta = p
        hh = dot(adj_hat, dot(h, w)) + b
        m = jnp.mean(hh, axis=-1, keepdims=True)
        v = jnp.mean((hh - m) ** 2, axis=-1, keepdims=True)
        return jnp.maximum((hh - m) * jax.lax.rsqrt(v + EPS) * gamma + beta, 0.0)

    h_pre = ref_mlp(x, params["pre_mlp"])
    h0 = ref_cell(h_pre, params["cells"][0])
    h1 = ref_cell(h0, params["cells"][1])
    s = ref_cell(h0 + h1, params["cells"][2])
    l = ref_cell(h0 + h1 + s, params["cells"][3])
    return ref_mlp(dot(pool_mat, l), params["post_mlp"])


# ----------------------------------- main ------------------------------------

if __name__ == "__main__":
    key = jax.random.PRNGKey(0)
    k_x, k_p = jax.random.split(key)

    # Node features [N, IN_DIM]; batch: first 8 nodes -> graph 0, rest -> graph 1.
    x = jax.random.normal(k_x, (N, IN_DIM), jnp.float32)
    batch = jnp.array([0] * 8 + [1] * 8, jnp.int32)

    # Undirected ring inside each graph -> edge_index [2, 32].
    src, dst = [], []
    for g in range(NUM_GRAPHS):
        base = g * 8
        for i in range(8):
            a, b = base + i, base + (i + 1) % 8
            src += [a, b]
            dst += [b, a]
    edge_index = jnp.array([src, dst], jnp.int32)

    adj_hat = build_adj_hat(edge_index, N)                              # [N, N]
    pool_mat = (batch[None, :] ==
                jnp.arange(NUM_GRAPHS)[:, None]).astype(jnp.float32)    # [G, N]

    params = init_params(k_p, IN_DIM, HID_DIM, OUT_DIM, NUM_CELLS)

    # One-time packing (hoisted out of the per-call path).
    packed = prepare_inputs(params, x, adj_hat, pool_mat)

    y = jax.block_until_ready(forward(*packed))
    assert y.shape == (NUM_GRAPHS, OUT_DIM)

    # Primary check: accurate-f32 reference (fidelity to the f32 PyTorch model).
    y_f32 = _ref_forward(params, x, adj_hat, pool_mat)
    ok = bool(jnp.allclose(y, y_f32, atol=1e-3, rtol=1e-3))
    if not ok:
        # The MXU contract precision used for f32 operands is an implementation
        # default; also accept the bf16-contract reference.
        y_bf16 = _ref_forward(params, x, adj_hat, pool_mat, bf16_dots=True)
        ok = bool(jnp.allclose(y, y_bf16, atol=2e-3, rtol=2e-3))
    assert ok, ("kernel/reference mismatch: max abs err vs f32 ref = "
                f"{float(jnp.max(jnp.abs(y - y_f32)))}")

    print("KERNEL_OK")
</pallas_src>

<mosaic_0001>
module attributes {stable_mosaic.version = 11 : i64} {
  func.func @fused_forward_kernel(%arg0: memref<16x128xf32, #tpu.memory_space<vmem>>, %arg1: memref<16x16xf32, #tpu.memory_space<vmem>>, %arg2: memref<8x16xf32, #tpu.memory_space<vmem>>, %arg3: memref<8x32x128xf32, #tpu.memory_space<vmem>>, %arg4: memref<16x128xf32, #tpu.memory_space<vmem>>, %arg5: memref<8x128xf32, #tpu.memory_space<vmem>>) attributes {dimension_semantics = [], scalar_prefetch = 0 : i64, scratch_operands = 0 : i64, tpu.core_type = #tpu.core_type<tc>} {
    %c0 = arith.constant 0 : index
    %c0_0 = arith.constant 0 : index
    %0 = vector.load %arg1[%c0, %c0_0] : memref<16x16xf32, #tpu.memory_space<vmem>>, vector<16x16xf32>
    %c0_1 = arith.constant 0 : index
    %c0_2 = arith.constant 0 : index
    %1 = vector.load %arg4[%c0_1, %c0_2] : memref<16x128xf32, #tpu.memory_space<vmem>>, vector<16x128xf32>
    %c0_3 = arith.constant 0 : index
    %c0_4 = arith.constant 0 : index
    %2 = vector.load %arg0[%c0_3, %c0_4] : memref<16x128xf32, #tpu.memory_space<vmem>>, vector<16x128xf32>
    %3 = vector.extract_strided_slice %2 {offsets = [0, 0], sizes = [16, 32], strides = [1, 1]} : vector<16x128xf32> to vector<16x32xf32>
    %c0_5 = arith.constant 0 : index
    %c0_6 = arith.constant 0 : index
    %c0_7 = arith.constant 0 : index
    %4 = vector.load %arg3[%c0_5, %c0_6, %c0_7] : memref<8x32x128xf32, #tpu.memory_space<vmem>>, vector<1x32x128xf32>
    %5 = vector.shape_cast %4 : vector<1x32x128xf32> to vector<32x128xf32>
    %cst = arith.constant dense<0.000000e+00> : vector<16x128xf32>
    %6 = tpu.matmul %3, %5, %cst {dimension_numbers = #tpu.dot_dimension_numbers<[1], [0], [0], [1], [0, 0, 1, 1], [], []>} : vector<16x32xf32>, vector<32x128xf32>, vector<16x128xf32> -> vector<16x128xf32>
    %7 = vector.extract_strided_slice %1 {offsets = [0, 0], sizes = [1, 128], strides = [1, 1]} : vector<16x128xf32> to vector<1x128xf32>
    %8 = vector.broadcast %7 : vector<1x128xf32> to vector<16x128xf32>
    %9 = arith.addf %6, %8 : vector<16x128xf32>
    %cst_8 = arith.constant 0.000000e+00 : f32
    %10 = vector.broadcast %cst_8 : f32 to vector<16x128xf32>
    %11 = arith.maximumf %9, %10 : vector<16x128xf32>
    %12 = vector.extract_strided_slice %11 {offsets = [0, 0], sizes = [16, 32], strides = [1, 1]} : vector<16x128xf32> to vector<16x32xf32>
    %c1 = arith.constant 1 : index
    %c0_9 = arith.constant 0 : index
    %c0_10 = arith.constant 0 : index
    %13 = vector.load %arg3[%c1, %c0_9, %c0_10] : memref<8x32x128xf32, #tpu.memory_space<vmem>>, vector<1x32x128xf32>
    %14 = vector.shape_cast %13 : vector<1x32x128xf32> to vector<32x128xf32>
    %cst_11 = arith.constant dense<0.000000e+00> : vector<16x128xf32>
    %15 = tpu.matmul %12, %14, %cst_11 {dimension_numbers = #tpu.dot_dimension_numbers<[1], [0], [0], [1], [0, 0, 1, 1], [], []>} : vector<16x32xf32>, vector<32x128xf32>, vector<16x128xf32> -> vector<16x128xf32>
    %16 = vector.extract_strided_slice %1 {offsets = [1, 0], sizes = [1, 128], strides = [1, 1]} : vector<16x128xf32> to vector<1x128xf32>
    %17 = vector.broadcast %16 : vector<1x128xf32> to vector<16x128xf32>
    %18 = arith.addf %15, %17 : vector<16x128xf32>
    %19 = vector.extract_strided_slice %18 {offsets = [0, 0], sizes = [16, 32], strides = [1, 1]} : vector<16x128xf32> to vector<16x32xf32>
    %c2 = arith.constant 2 : index
    %c0_12 = arith.constant 0 : index
    %c0_13 = arith.constant 0 : index
    %20 = vector.load %arg3[%c2, %c0_12, %c0_13] : memref<8x32x128xf32, #tpu.memory_space<vmem>>, vector<1x32x128xf32>
    %21 = vector.shape_cast %20 : vector<1x32x128xf32> to vector<32x128xf32>
    %cst_14 = arith.constant dense<0.000000e+00> : vector<16x128xf32>
    %22 = tpu.matmul %19, %21, %cst_14 {dimension_numbers = #tpu.dot_dimension_numbers<[1], [0], [0], [1], [0, 0, 1, 1], [], []>} : vector<16x32xf32>, vector<32x128xf32>, vector<16x128xf32> -> vector<16x128xf32>
    %cst_15 = arith.constant dense<0.000000e+00> : vector<16x128xf32>
    %23 = tpu.matmul %0, %22, %cst_15 {dimension_numbers = #tpu.dot_dimension_numbers<[1], [0], [0], [1], [0, 0, 1, 1], [], []>} : vector<16x16xf32>, vector<16x128xf32>, vector<16x128xf32> -> vector<16x128xf32>
    %24 = vector.extract_strided_slice %1 {offsets = [2, 0], sizes = [1, 128], strides = [1, 1]} : vector<16x128xf32> to vector<1x128xf32>
    %25 = vector.broadcast %24 : vector<1x128xf32> to vector<16x128xf32>
    %26 = arith.addf %23, %25 : vector<16x128xf32>
    %cst_16 = arith.constant dense<0.000000e+00> : vector<16xf32>
    %27 = vector.multi_reduction <add>, %26, %cst_16 [1] : vector<16x128xf32> to vector<16xf32>
    %28 = vector.shape_cast %27 : vector<16xf32> to vector<16x1xf32>
    %cst_17 = arith.constant 3.125000e-02 : f32
    %29 = vector.broadcast %cst_17 : f32 to vector<16x1xf32>
    %30 = arith.mulf %28, %29 : vector<16x1xf32>
    %31 = arith.mulf %26, %26 : vector<16x128xf32>
    %cst_18 = arith.constant dense<0.000000e+00> : vector<16xf32>
    %32 = vector.multi_reduction <add>, %31, %cst_18 [1] : vector<16x128xf32> to vector<16xf32>
    %33 = vector.shape_cast %32 : vector<16xf32> to vector<16x1xf32>
    %cst_19 = arith.constant 3.125000e-02 : f32
    %34 = vector.broadcast %cst_19 : f32 to vector<16x1xf32>
    %35 = arith.mulf %33, %34 : vector<16x1xf32>
    %36 = arith.mulf %30, %30 : vector<16x1xf32>
    %37 = arith.subf %35, %36 : vector<16x1xf32>
    %38 = vector.broadcast %30 : vector<16x1xf32> to vector<16x128xf32>
    %39 = arith.subf %26, %38 : vector<16x128xf32>
    %cst_20 = arith.constant 9.99999974E-6 : f32
    %40 = vector.broadcast %cst_20 : f32 to vector<16x1xf32>
    %41 = arith.addf %37, %40 : vector<16x1xf32>
    %42 = math.rsqrt %41 : vector<16x1xf32>
    %43 = vector.broadcast %42 : vector<16x1xf32> to vector<16x128xf32>
    %44 = arith.mulf %39, %43 : vector<16x128xf32>
    %45 = vector.extract_strided_slice %1 {offsets = [3, 0], sizes = [1, 128], strides = [1, 1]} : vector<16x128xf32> to vector<1x128xf32>
    %46 = vector.broadcast %45 : vector<1x128xf32> to vector<16x128xf32>
    %47 = arith.mulf %44, %46 : vector<16x128xf32>
    %48 = vector.extract_strided_slice %1 {offsets = [4, 0], sizes = [1, 128], strides = [1, 1]} : vector<16x128xf32> to vector<1x128xf32>
    %49 = vector.broadcast %48 : vector<1x128xf32> to vector<16x128xf32>
    %50 = arith.addf %47, %49 : vector<16x128xf32>
    %cst_21 = arith.constant 0.000000e+00 : f32
    %51 = vector.broadcast %cst_21 : f32 to vector<16x128xf32>
    %52 = arith.maximumf %50, %51 : vector<16x128xf32>
    %53 = vector.extract_strided_slice %52 {offsets = [0, 0], sizes = [16, 32], strides = [1, 1]} : vector<16x128xf32> to vector<16x32xf32>
    %c3 = arith.constant 3 : index
    %c0_22 = arith.constant 0 : index
    %c0_23 = arith.constant 0 : index
    %54 = vector.load %arg3[%c3, %c0_22, %c0_23] : memref<8x32x128xf32, #tpu.memory_space<vmem>>, vector<1x32x128xf32>
    %55 = vector.shape_cast %54 : vector<1x32x128xf32> to vector<32x128xf32>
    %cst_24 = arith.constant dense<0.000000e+00> : vector<16x128xf32>
    %56 = tpu.matmul %53, %55, %cst_24 {dimension_numbers = #tpu.dot_dimension_numbers<[1], [0], [0], [1], [0, 0, 1, 1], [], []>} : vector<16x32xf32>, vector<32x128xf32>, vector<16x128xf32> -> vector<16x128xf32>
    %cst_25 = arith.constant dense<0.000000e+00> : vector<16x128xf32>
    %57 = tpu.matmul %0, %56, %cst_25 {dimension_numbers = #tpu.dot_dimension_numbers<[1], [0], [0], [1], [0, 0, 1, 1], [], []>} : vector<16x16xf32>, vector<16x128xf32>, vector<16x128xf32> -> vector<16x128xf32>
    %58 = vector.extract_strided_slice %1 {offsets = [5, 0], sizes = [1, 128], strides = [1, 1]} : vector<16x128xf32> to vector<1x128xf32>
    %59 = vector.broadcast %58 : vector<1x128xf32> to vector<16x128xf32>
    %60 = arith.addf %57, %59 : vector<16x128xf32>
    %cst_26 = arith.constant dense<0.000000e+00> : vector<16xf32>
    %61 = vector.multi_reduction <add>, %60, %cst_26 [1] : vector<16x128xf32> to vector<16xf32>
    %62 = vector.shape_cast %61 : vector<16xf32> to vector<16x1xf32>
    %cst_27 = arith.constant 3.125000e-02 : f32
    %63 = vector.broadcast %cst_27 : f32 to vector<16x1xf32>
    %64 = arith.mulf %62, %63 : vector<16x1xf32>
    %65 = arith.mulf %60, %60 : vector<16x128xf32>
    %cst_28 = arith.constant dense<0.000000e+00> : vector<16xf32>
    %66 = vector.multi_reduction <add>, %65, %cst_28 [1] : vector<16x128xf32> to vector<16xf32>
    %67 = vector.shape_cast %66 : vector<16xf32> to vector<16x1xf32>
    %cst_29 = arith.constant 3.125000e-02 : f32
    %68 = vector.broadcast %cst_29 : f32 to vector<16x1xf32>
    %69 = arith.mulf %67, %68 : vector<16x1xf32>
    %70 = arith.mulf %64, %64 : vector<16x1xf32>
    %71 = arith.subf %69, %70 : vector<16x1xf32>
    %72 = vector.broadcast %64 : vector<16x1xf32> to vector<16x128xf32>
    %73 = arith.subf %60, %72 : vector<16x128xf32>
    %cst_30 = arith.constant 9.99999974E-6 : f32
    %74 = vector.broadcast %cst_30 : f32 to vector<16x1xf32>
    %75 = arith.addf %71, %74 : vector<16x1xf32>
    %76 = math.rsqrt %75 : vector<16x1xf32>
    %77 = vector.broadcast %76 : vector<16x1xf32> to vector<16x128xf32>
    %78 = arith.mulf %73, %77 : vector<16x128xf32>
    %79 = vector.extract_strided_slice %1 {offsets = [6, 0], sizes = [1, 128], strides = [1, 1]} : vector<16x128xf32> to vector<1x128xf32>
    %80 = vector.broadcast %79 : vector<1x128xf32> to vector<16x128xf32>
    %81 = arith.mulf %78, %80 : vector<16x128xf32>
    %82 = vector.extract_strided_slice %1 {offsets = [7, 0], sizes = [1, 128], strides = [1, 1]} : vector<16x128xf32> to vector<1x128xf32>
    %83 = vector.broadcast %82 : vector<1x128xf32> to vector<16x128xf32>
    %84 = arith.addf %81, %83 : vector<16x128xf32>
    %cst_31 = arith.constant 0.000000e+00 : f32
    %85 = vector.broadcast %cst_31 : f32 to vector<16x128xf32>
    %86 = arith.maximumf %84, %85 : vector<16x128xf32>
    %87 = arith.addf %52, %86 : vector<16x128xf32>
    %88 = vector.extract_strided_slice %87 {offsets = [0, 0], sizes = [16, 32], strides = [1, 1]} : vector<16x128xf32> to vector<16x32xf32>
    %c4 = arith.constant 4 : index
    %c0_32 = arith.constant 0 : index
    %c0_33 = arith.constant 0 : index
    %89 = vector.load %arg3[%c4, %c0_32, %c0_33] : memref<8x32x128xf32, #tpu.memory_space<vmem>>, vector<1x32x128xf32>
    %90 = vector.shape_cast %89 : vector<1x32x128xf32> to vector<32x128xf32>
    %cst_34 = arith.constant dense<0.000000e+00> : vector<16x128xf32>
    %91 = tpu.matmul %88, %90, %cst_34 {dimension_numbers = #tpu.dot_dimension_numbers<[1], [0], [0], [1], [0, 0, 1, 1], [], []>} : vector<16x32xf32>, vector<32x128xf32>, vector<16x128xf32> -> vector<16x128xf32>
    %cst_35 = arith.constant dense<0.000000e+00> : vector<16x128xf32>
    %92 = tpu.matmul %0, %91, %cst_35 {dimension_numbers = #tpu.dot_dimension_numbers<[1], [0], [0], [1], [0, 0, 1, 1], [], []>} : vector<16x16xf32>, vector<16x128xf32>, vector<16x128xf32> -> vector<16x128xf32>
    %93 = vector.extract_strided_slice %1 {offsets = [8, 0], sizes = [1, 128], strides = [1, 1]} : vector<16x128xf32> to vector<1x128xf32>
    %94 = vector.broadcast %93 : vector<1x128xf32> to vector<16x128xf32>
    %95 = arith.addf %92, %94 : vector<16x128xf32>
    %cst_36 = arith.constant dense<0.000000e+00> : vector<16xf32>
    %96 = vector.multi_reduction <add>, %95, %cst_36 [1] : vector<16x128xf32> to vector<16xf32>
    %97 = vector.shape_cast %96 : vector<16xf32> to vector<16x1xf32>
    %cst_37 = arith.constant 3.125000e-02 : f32
    %98 = vector.broadcast %cst_37 : f32 to vector<16x1xf32>
    %99 = arith.mulf %97, %98 : vector<16x1xf32>
    %100 = arith.mulf %95, %95 : vector<16x128xf32>
    %cst_38 = arith.constant dense<0.000000e+00> : vector<16xf32>
    %101 = vector.multi_reduction <add>, %100, %cst_38 [1] : vector<16x128xf32> to vector<16xf32>
    %102 = vector.shape_cast %101 : vector<16xf32> to vector<16x1xf32>
    %cst_39 = arith.constant 3.125000e-02 : f32
    %103 = vector.broadcast %cst_39 : f32 to vector<16x1xf32>
    %104 = arith.mulf %102, %103 : vector<16x1xf32>
    %105 = arith.mulf %99, %99 : vector<16x1xf32>
    %106 = arith.subf %104, %105 : vector<16x1xf32>
    %107 = vector.broadcast %99 : vector<16x1xf32> to vector<16x128xf32>
    %108 = arith.subf %95, %107 : vector<16x128xf32>
    %cst_40 = arith.constant 9.99999974E-6 : f32
    %109 = vector.broadcast %cst_40 : f32 to vector<16x1xf32>
    %110 = arith.addf %106, %109 : vector<16x1xf32>
    %111 = math.rsqrt %110 : vector<16x1xf32>
    %112 = vector.broadcast %111 : vector<16x1xf32> to vector<16x128xf32>
    %113 = arith.mulf %108, %112 : vector<16x128xf32>
    %114 = vector.extract_strided_slice %1 {offsets = [9, 0], sizes = [1, 128], strides = [1, 1]} : vector<16x128xf32> to vector<1x128xf32>
    %115 = vector.broadcast %114 : vector<1x128xf32> to vector<16x128xf32>
    %116 = arith.mulf %113, %115 : vector<16x128xf32>
    %117 = vector.extract_strided_slice %1 {offsets = [10, 0], sizes = [1, 128], strides = [1, 1]} : vector<16x128xf32> to vector<1x128xf32>
    %118 = vector.broadcast %117 : vector<1x128xf32> to vector<16x128xf32>
    %119 = arith.addf %116, %118 : vector<16x128xf32>
    %cst_41 = arith.constant 0.000000e+00 : f32
    %120 = vector.broadcast %cst_41 : f32 to vector<16x128xf32>
    %121 = arith.maximumf %119, %120 : vector<16x128xf32>
    %122 = arith.addf %87, %121 : vector<16x128xf32>
    %123 = vector.extract_strided_slice %122 {offsets = [0, 0], sizes = [16, 32], strides = [1, 1]} : vector<16x128xf32> to vector<16x32xf32>
    %c5 = arith.constant 5 : index
    %c0_42 = arith.constant 0 : index
    %c0_43 = arith.constant 0 : index
    %124 = vector.load %arg3[%c5, %c0_42, %c0_43] : memref<8x32x128xf32, #tpu.memory_space<vmem>>, vector<1x32x128xf32>
    %125 = vector.shape_cast %124 : vector<1x32x128xf32> to vector<32x128xf32>
    %cst_44 = arith.constant dense<0.000000e+00> : vector<16x128xf32>
    %126 = tpu.matmul %123, %125, %cst_44 {dimension_numbers = #tpu.dot_dimension_numbers<[1], [0], [0], [1], [0, 0, 1, 1], [], []>} : vector<16x32xf32>, vector<32x128xf32>, vector<16x128xf32> -> vector<16x128xf32>
    %cst_45 = arith.constant dense<0.000000e+00> : vector<16x128xf32>
    %127 = tpu.matmul %0, %126, %cst_45 {dimension_numbers = #tpu.dot_dimension_numbers<[1], [0], [0], [1], [0, 0, 1, 1], [], []>} : vector<16x16xf32>, vector<16x128xf32>, vector<16x128xf32> -> vector<16x128xf32>
    %128 = vector.extract_strided_slice %1 {offsets = [11, 0], sizes = [1, 128], strides = [1, 1]} : vector<16x128xf32> to vector<1x128xf32>
    %129 = vector.broadcast %128 : vector<1x128xf32> to vector<16x128xf32>
    %130 = arith.addf %127, %129 : vector<16x128xf32>
    %cst_46 = arith.constant dense<0.000000e+00> : vector<16xf32>
    %131 = vector.multi_reduction <add>, %130, %cst_46 [1] : vector<16x128xf32> to vector<16xf32>
    %132 = vector.shape_cast %131 : vector<16xf32> to vector<16x1xf32>
    %cst_47 = arith.constant 3.125000e-02 : f32
    %133 = vector.broadcast %cst_47 : f32 to vector<16x1xf32>
    %134 = arith.mulf %132, %133 : vector<16x1xf32>
    %135 = arith.mulf %130, %130 : vector<16x128xf32>
    %cst_48 = arith.constant dense<0.000000e+00> : vector<16xf32>
    %136 = vector.multi_reduction <add>, %135, %cst_48 [1] : vector<16x128xf32> to vector<16xf32>
    %137 = vector.shape_cast %136 : vector<16xf32> to vector<16x1xf32>
    %cst_49 = arith.constant 3.125000e-02 : f32
    %138 = vector.broadcast %cst_49 : f32 to vector<16x1xf32>
    %139 = arith.mulf %137, %138 : vector<16x1xf32>
    %140 = arith.mulf %134, %134 : vector<16x1xf32>
    %141 = arith.subf %139, %140 : vector<16x1xf32>
    %142 = vector.broadcast %134 : vector<16x1xf32> to vector<16x128xf32>
    %143 = arith.subf %130, %142 : vector<16x128xf32>
    %cst_50 = arith.constant 9.99999974E-6 : f32
    %144 = vector.broadcast %cst_50 : f32 to vector<16x1xf32>
    %145 = arith.addf %141, %144 : vector<16x1xf32>
    %146 = math.rsqrt %145 : vector<16x1xf32>
    %147 = vector.broadcast %146 : vector<16x1xf32> to vector<16x128xf32>
    %148 = arith.mulf %143, %147 : vector<16x128xf32>
    %149 = vector.extract_strided_slice %1 {offsets = [12, 0], sizes = [1, 128], strides = [1, 1]} : vector<16x128xf32> to vector<1x128xf32>
    %150 = vector.broadcast %149 : vector<1x128xf32> to vector<16x128xf32>
    %151 = arith.mulf %148, %150 : vector<16x128xf32>
    %152 = vector.extract_strided_slice %1 {offsets = [13, 0], sizes = [1, 128], strides = [1, 1]} : vector<16x128xf32> to vector<1x128xf32>
    %153 = vector.broadcast %152 : vector<1x128xf32> to vector<16x128xf32>
    %154 = arith.addf %151, %153 : vector<16x128xf32>
    %cst_51 = arith.constant 0.000000e+00 : f32
    %155 = vector.broadcast %cst_51 : f32 to vector<16x128xf32>
    %156 = arith.maximumf %154, %155 : vector<16x128xf32>
    %c0_52 = arith.constant 0 : index
    %c0_53 = arith.constant 0 : index
    %157 = vector.load %arg2[%c0_52, %c0_53] : memref<8x16xf32, #tpu.memory_space<vmem>>, vector<8x16xf32>
    %cst_54 = arith.constant dense<0.000000e+00> : vector<8x128xf32>
    %158 = tpu.matmul %157, %156, %cst_54 {dimension_numbers = #tpu.dot_dimension_numbers<[1], [0], [0], [1], [0, 0, 1, 1], [], []>} : vector<8x16xf32>, vector<16x128xf32>, vector<8x128xf32> -> vector<8x128xf32>
    %159 = vector.extract_strided_slice %158 {offsets = [0, 0], sizes = [8, 32], strides = [1, 1]} : vector<8x128xf32> to vector<8x32xf32>
    %c6 = arith.constant 6 : index
    %c0_55 = arith.constant 0 : index
    %c0_56 = arith.constant 0 : index
    %160 = vector.load %arg3[%c6, %c0_55, %c0_56] : memref<8x32x128xf32, #tpu.memory_space<vmem>>, vector<1x32x128xf32>
    %161 = vector.shape_cast %160 : vector<1x32x128xf32> to vector<32x128xf32>
    %cst_57 = arith.constant dense<0.000000e+00> : vector<8x128xf32>
    %162 = tpu.matmul %159, %161, %cst_57 {dimension_numbers = #tpu.dot_dimension_numbers<[1], [0], [0], [1], [0, 0, 1, 1], [], []>} : vector<8x32xf32>, vector<32x128xf32>, vector<8x128xf32> -> vector<8x128xf32>
    %163 = vector.extract_strided_slice %1 {offsets = [14, 0], sizes = [1, 128], strides = [1, 1]} : vector<16x128xf32> to vector<1x128xf32>
    %164 = vector.broadcast %163 : vector<1x128xf32> to vector<8x128xf32>
    %165 = arith.addf %162, %164 : vector<8x128xf32>
    %cst_58 = arith.constant 0.000000e+00 : f32
    %166 = vector.broadcast %cst_58 : f32 to vector<8x128xf32>
    %167 = arith.maximumf %165, %166 : vector<8x128xf32>
    %168 = vector.extract_strided_slice %167 {offsets = [0, 0], sizes = [8, 32], strides = [1, 1]} : vector<8x128xf32> to vector<8x32xf32>
    %c7 = arith.constant 7 : index
    %c0_59 = arith.constant 0 : index
    %c0_60 = arith.constant 0 : index
    %169 = vector.load %arg3[%c7, %c0_59, %c0_60] : memref<8x32x128xf32, #tpu.memory_space<vmem>>, vector<1x32x128xf32>
    %170 = vector.shape_cast %169 : vector<1x32x128xf32> to vector<32x128xf32>
    %cst_61 = arith.constant dense<0.000000e+00> : vector<8x128xf32>
    %171 = tpu.matmul %168, %170, %cst_61 {dimension_numbers = #tpu.dot_dimension_numbers<[1], [0], [0], [1], [0, 0, 1, 1], [], []>} : vector<8x32xf32>, vector<32x128xf32>, vector<8x128xf32> -> vector<8x128xf32>
    %172 = vector.extract_strided_slice %1 {offsets = [15, 0], sizes = [1, 128], strides = [1, 1]} : vector<16x128xf32> to vector<1x128xf32>
    %173 = vector.broadcast %172 : vector<1x128xf32> to vector<8x128xf32>
    %174 = arith.addf %171, %173 : vector<8x128xf32>
    %c0_62 = arith.constant 0 : index
    %c0_63 = arith.constant 0 : index
    %175 = vector.load %arg5[%c0_62, %c0_63] : memref<8x128xf32, #tpu.memory_space<vmem>>, vector<8x128xf32>
    tpu.vector_store %arg5[%c0_62, %c0_63], %174 {strides = array<i32>} : memref<8x128xf32, #tpu.memory_space<vmem>>, vector<8x128xf32>,
    return
  }
}

</mosaic_0001>

<bundles_post_ra>
// kernel: forward.1
= control target key start
LH: loop header
LB: loop body
LE: loop exit
PB: predicated region body
PF: predicated region fallthrough
CT: control target
= control target key end

     0   :  { %10 = vsyncpa [#allocation3], 0  ;;  %s2028_s0 = inlined_call_operand.hbm [shape: f32[16,128], index: 0, kind: input, shape index: {}]   ;;  %s2029_s1 = inlined_call_operand.hbm [shape: f32[16,16], index: 1, kind: input, shape index: {}]   ;;  %s2030_s2 = inlined_call_operand.hbm [shape: f32[8,16], index: 2, kind: input, shape index: {}]   ;;  %s2031_s3 = inlined_call_operand.hbm [shape: f32[8,32,128], index: 3, kind: input, shape index: {}]   ;;  %s2032_s4 = inlined_call_operand.hbm [shape: f32[16,128], index: 4, kind: input, shape index: {}]   ;;  %s2033_s5 = inlined_call_operand.vmem [shape: f32[8,128], index: 5, kind: output, shape index: {}]  }
   0x1   :  { %11 = vsyncpa [#allocation5], 0 }
   0x2   :  { %12 = vsyncpa [#allocation8], 0  ;;  %s1784_s18 = smov [#allocation4]   ;;  %s1785_s20 = smov [#allocation7]  }
   0x3   :  { %s30_s19 = sshll.u32 %s1784_s18, 4  ;;  %s52_s21 = sshll.u32 %s1785_s20, 4  ;;  %s31_s19 = int_to_ptr.vmem [resolvable:$true] %s30_s19  ;;  %s1824_s21 = int_to_ptr.vmem [resolvable:$true] %s52_s21 }
   0x4   :  { %s1668_s24 = scalar_lea.hbm %s2029_s1, 256 }
   0x5   :  { %p1669_p0 = scmp.ne.s32.totalorder %s2029_s1, %s1668_s24  ;;  %p1672_p1 = scmp.lt.u32.totalorder %s1668_s24, %s2029_s1 }
   0x7   :  { %p1674_p2 = pnand %p1672_p1, %p1669_p0 }
   0x9   :  { %1677 = shalt.err (!%p1674_p2)
}
   0xa   :  { %s1678_s29 = scalar_lea.vmem %s31_s19, 256  ;;  %p1683_p4 = scmp.lt.s32.totalorder %s31_s19, %s31_s19 }
   0xb   :  { %p1679_p3 = scmp.ne.s32.totalorder %s31_s19, %s1678_s29  ;;  %p1684_p5 = scmp.lt.s32.totalorder %s1678_s29, %s1678_s29 }
   0xd   :  { %p1685_p6 = por %p1684_p5, %p1683_p4 }
   0xf   :  { %p1686_p7 = pnand %p1685_p6, %p1679_p3 }
  0x11   :  { %1689 = shalt.err (!%p1686_p7)
}
  0x12   :  { %s1786_s30 = smov 128   ;;  %s1787_s6 = smov 8  }
  0x13   :  { %36 = dma.hbm_to_vmem [thread:$0]  %s2029_s1, 256, %s31_s19, [#allocation5], %s1786_s30, %s1786_s30, %s1787_s6  }
  0x14   :  { %s1690_s11 = scalar_lea.hbm %s2031_s3, 4096 }
  0x15   :  { %p1691_p8 = scmp.ne.s32.totalorder %s2031_s3, %s1690_s11  ;;  %p1694_p9 = scmp.lt.u32.totalorder %s1690_s11, %s2031_s3 }
  0x17   :  { %p1696_p10 = pnand %p1694_p9, %p1691_p8 }
  0x19   :  { %1699 = shalt.err (!%p1696_p10)
}
  0x1a   :  { %s1700_s16 = scalar_lea.vmem %s1824_s21, 4096  ;;  %p1705_p12 = scmp.lt.s32.totalorder %s1824_s21, %s1824_s21 }
  0x1b   :  { %p1701_p11 = scmp.ne.s32.totalorder %s1824_s21, %s1700_s16  ;;  %p1706_p13 = scmp.lt.s32.totalorder %s1700_s16, %s1700_s16 }
  0x1d   :  { %p1707_p0 = por %p1706_p13, %p1705_p12 }
  0x1f   :  { %p1708_p1 = pnand %p1707_p0, %p1701_p11 }
  0x21   :  { %1711 = shalt.err (!%p1708_p1)
}
  0x22   :  { %58 = dma.hbm_to_vmem [thread:$0]  %s2031_s3, 4096, %s1824_s21, [#allocation8], %s1786_s30, %s1786_s30, %s1787_s6  }
  0x23   :  { %s1788_s18 = smov [#allocation2]   ;;  %s1789_s20 = smov [#allocation6]  }
  0x24   :  { %s18_s19 = sshll.u32 %s1788_s18, 4  ;;  %s43_s22 = sshll.u32 %s1789_s20, 4  ;;  %s19_s19 = int_to_ptr.vmem [resolvable:$true] %s18_s19  ;;  %s44_s22 = int_to_ptr.vmem [resolvable:$true] %s43_s22 }
  0x25   :  { %s1712_s25 = scalar_lea.hbm %s2028_s0, 256 }
  0x26   :  { %p1713_p2 = scmp.ne.s32.totalorder %s2028_s0, %s1712_s25  ;;  %p1716_p3 = scmp.lt.u32.totalorder %s1712_s25, %s2028_s0 }
  0x28   :  { %p1718_p4 = pnand %p1716_p3, %p1713_p2 }
  0x2a   :  { %1721 = shalt.err (!%p1718_p4)
}
  0x2b   :  { %s1722_s3 = scalar_lea.vmem %s19_s19, 256  ;;  %p1727_p6 = scmp.lt.s32.totalorder %s19_s19, %s19_s19 }
  0x2c   :  { %p1723_p5 = scmp.ne.s32.totalorder %s19_s19, %s1722_s3  ;;  %p1728_p7 = scmp.lt.s32.totalorder %s1722_s3, %s1722_s3 }
  0x2e   :  { %p1729_p8 = por %p1728_p7, %p1727_p6 }
  0x30   :  { %p1730_p9 = pnand %p1729_p8, %p1723_p5 }
  0x32   :  { %1733 = shalt.err (!%p1730_p9)
}
  0x33   :  { %24 = dma.hbm_to_vmem [thread:$0]  %s2028_s0, 256, %s19_s19, [#allocation3], %s1786_s30, %s1786_s30, %s1787_s6  }
  0x34   :  { %s1734_s10 = scalar_lea.hbm %s2030_s2, 128 }
  0x35   :  { %p1735_p10 = scmp.ne.s32.totalorder %s2030_s2, %s1734_s10  ;;  %p1738_p11 = scmp.lt.u32.totalorder %s1734_s10, %s2030_s2 }
  0x37   :  { %p1740_p12 = pnand %p1738_p11, %p1735_p10 }
  0x39   :  { %1743 = shalt.err (!%p1740_p12)
}
  0x3a   :  { %s1744_s15 = scalar_lea.vmem %s44_s22, 128  ;;  %p1749_p0 = scmp.lt.s32.totalorder %s44_s22, %s44_s22 }
  0x3b   :  { %p1745_p13 = scmp.ne.s32.totalorder %s44_s22, %s1744_s15  ;;  %p1750_p1 = scmp.lt.s32.totalorder %s1744_s15, %s1744_s15 }
  0x3d   :  { %p1751_p2 = por %p1750_p1, %p1749_p0 }
  0x3f   :  { %p1752_p3 = pnand %p1751_p2, %p1745_p13 }
  0x41   :  { %1755 = shalt.err (!%p1752_p3)
}
  0x42   :  { %46 = dma.hbm_to_vmem [thread:$0]  %s2030_s2, 128, %s44_s22, [#allocation5]  }
  0x43   :  { %s1790_s1 = smov [#allocation9]   ;;  %s1756_s20 = scalar_lea.hbm %s2032_s4, 256 }
  0x44   :  { %s64_s17 = sshll.u32 %s1790_s1, 4  ;;  %p1757_p4 = scmp.ne.s32.totalorder %s2032_s4, %s1756_s20  ;;  %s65_s17 = int_to_ptr.vmem [resolvable:$true] %s64_s17 }
  0x45   :  { %p1760_p5 = scmp.lt.u32.totalorder %s1756_s20, %s2032_s4 }
  0x47   :  { %p1762_p6 = pnand %p1760_p5, %p1757_p4 }
  0x49   :  { %1765 = shalt.err (!%p1762_p6)
}
  0x4a   :  { %s1766_s27 = scalar_lea.vmem %s65_s17, 256  ;;  %p1771_p8 = scmp.lt.s32.totalorder %s65_s17, %s65_s17 }
  0x4b   :  { %p1767_p7 = scmp.ne.s32.totalorder %s65_s17, %s1766_s27  ;;  %p1772_p9 = scmp.lt.s32.totalorder %s1766_s27, %s1766_s27 }
  0x4d   :  { %p1773_p10 = por %p1772_p9, %p1771_p8 }
  0x4f   :  { %p1774_p11 = pnand %p1773_p10, %p1767_p7 }
  0x51   :  { %1777 = shalt.err (!%p1774_p11)
}
  0x52   :  { %70 = dma.hbm_to_vmem [thread:$0]  %s2032_s4, 256, %s65_s17, [#allocation8], %s1786_s30, %s1786_s30, %s1787_s6  }
  0x53   :  { %1778 = dma.done.wait [#allocation3], 256  }
  0x54   :  { %1779 = vsyncadd [#allocation3], 4294967040 }
  0x55   :  { %1780 = dma.done.wait [#allocation5], 384  }
  0x56   :  { %1781 = vsyncadd [#allocation5], 4294966912 }
  0x57   :  { %1782 = dma.done.wait [#allocation8], 4352  }
  0x58   :  { %1783 = vsyncadd [#allocation8], 4294962944  ;;  %vm100_vm0 = vcmask 261120   ;;  %v92_v0 = vld [vmem:[#allocation7] sm:$0xff]  ;;  %v93_v1 = vld [vmem:[#allocation7 + $0x8] sm:$0xff]  ;;  %v96_v17 = vlaneseq  ;;  %vm364_vm1 = vcmask 130048  }
  0x59   :  { %v94_v2 = vld [vmem:[#allocation7 + $0x10] sm:$0xff]  ;;  %v1563_v3 = vpack.c.bf16 %v93_v1, %v92_v0  ;;  %v95_v4 = vld [vmem:[#allocation7 + $0x18] sm:$0xff]  ;;  %v185_v7 = vld [vmem:[#allocation7 + $0x20] sm:$0xff]  ;;  %vm1792_vm2 = vmmov 0  }
  0x5a   :  { %v90_v5 = vld [vmem:[#allocation2] sm:$0xff]  ;;  %v1567_v6 = vpack.c.bf16 %v95_v4, %v94_v2  ;;  %v186_v8 = vld [vmem:[#allocation7 + $0x28] sm:$0xff]  ;;  %v91_v10 = vld [vmem:[#allocation2 + $0x8] sm:$0xff]  ;;  %v1905_v18 = vshrl.u32 %v96_v17, 7 }
  0x5b   :  { %1448 = vmatprep.mubr.msk.f32.mxu0 %vm100_vm0, %v90_v5  ;;  %1564 = vmatprep.subr.bf16.mxu0 %v1563_v3  ;;  %v1571_v9 = vpack.c.bf16 %v186_v8, %v185_v7  ;;  %v187_v11 = vld [vmem:[#allocation7 + $0x30] sm:$0xff]  ;;  %v188_v12 = vld [vmem:[#allocation7 + $0x38] sm:$0xff]  ;;  %v275_v14 = vld [vmem:[#allocation7 + $0x40] sm:$0xff] }
  0x5c   :  { %1566 = vmatpush3.bf16.msra.mxu0 %v1563_v3  ;;  %v1575_v13 = vpack.c.bf16 %v188_v12, %v187_v11  ;;  %v276_v15 = vld [vmem:[#allocation7 + $0x48] sm:$0xff]  ;;  %v98_v19 = vsub.s32 0, %v1905_v18  ;;  %v1908_v20 = vld [vmem:[#allocation9] sm:$0xff]  ;;  %v277_v28 = vld [vmem:[#allocation7 + $0x50] sm:$0xff]  ;;  %v191_v31 = vsub.s32 1, %v1905_v18  ;;  %v362_v42 = vsub.s32 2, %v1905_v18 }
  0x5d   :  { %1568 = vmatprep.subr.bf16.mxu0 %v1567_v6  ;;  %1572 = vmatprep.subr.bf16.mxu1 %v1571_v9  ;;  %v1579_v16 = vpack.c.bf16 %v276_v15, %v275_v14  ;;  %v278_v29 = vld [vmem:[#allocation7 + $0x58] sm:$0xff]  ;;  %v1921_v37 = vld [vmem:[#allocation4] sm:$0xff]  ;;  %v1927_v41 = vld [vmem:[#allocation4 + $0x8] sm:$0xff]  ;;  %v480_v7 = vsub.s32 4, %v1905_v18 }
  0x5e   :  { %1574 = vmatpush3.bf16.msra.mxu1 %v1571_v9  ;;  %v99_v21 = vrot.slane %v1908_v20, %v98_v19  ;;  %v1583_v30 = vpack.c.bf16 %v278_v29, %v277_v28  ;;  %v192_v32 = vrot.slane %v1908_v20, %v191_v31  ;;  %v363_v43 = vrot.slane %v1908_v20, %v362_v42  ;;  %v487_v50 = vld [vmem:[#allocation7 + $0x60] sm:$0xff]  ;;  %v488_v51 = vld [vmem:[#allocation7 + $0x68] sm:$0xff]  ;;  %v489_v53 = vld [vmem:[#allocation7 + $0x70] sm:$0xff] }
  0x5f   :  { %1576 = vmatprep.subr.bf16.mxu1 %v1575_v13  ;;  %v1591_v52 = vpack.c.bf16 %v488_v51, %v487_v50  ;;  %v490_v54 = vld [vmem:[#allocation7 + $0x78] sm:$0xff]  ;;  %v481_v12 = vrot.slane %v1908_v20, %v480_v7  ;;  %v574_v28 = vsub.s32 5, %v1905_v18 }
  0x60   :  { %1570 = vmatpush3.bf16.msra.mxu0 %v1567_v6  ;;  %v1595_v55 = vpack.c.bf16 %v490_v54, %v489_v53  ;;  %v474_v6 = vsub.s32 3, %v1905_v18 }
  0x61   :  { %1580 = vmatprep.subr.bf16.mxu0 %v1579_v16  ;;  %v575_v29 = vrot.slane %v1908_v20, %v574_v28 }
  0x62   :  { %1578 = vmatpush3.bf16.msra.mxu1 %v1575_v13  ;;  %v475_v9 = vrot.slane %v1908_v20, %v474_v6 }
  0x63   :  { %1449 = vmatmul.mubr.msk.f32.vlgmr.msra.gmra.mrb[0].mxu0 %vm100_vm0, %v91_v10 }
  0x64   :  { %1582 = vmatpush3.bf16.msra.mxu0 %v1579_v16 }
  0x65   :  { %1584 = vmatprep.subr.bf16.mxu0 %v1583_v30 }
  0x68   :  { %1586 = vmatpush3.bf16.msra.mxu0 %v1583_v30 }
 0x136   :  { %v1450_v22 = vpop.f32.mrb[0].mxu0 }
 0x137   :  { %v179_v23 = vadd.f32 %v1450_v22, %v99_v21  ;;  %v173_v24 = vpop.f32.mrb[1].mxu0 }
 0x138   :  { %v174_v25 = vadd.f32 %v173_v24, %v99_v21 }
 0x139   :  { %v183_v27 = vmax.f32 %v179_v23, 0.0 }
 0x13a   :  { %v182_v26 = vmax.f32 %v174_v25, 0.0 }
 0x13c   :  { %1459 = vmatprep.mubr.msk.f32.mxu1 %vm100_vm0, %v182_v26 }
 0x13d   :  { %1460 = vmatmul.mubr.msk.f32.vlgmr.msra.gmra.mrb[0].mxu1 %vm100_vm0, %v183_v27 }
 0x13e   :  { %1477 = vmatprep.mubr.msk.f32.mxu1 %vm364_vm1, %v1921_v37 }
 0x210   :  { %v1461_v33 = vpop.f32.mrb[0].mxu1 }
 0x211   :  { %v265_v34 = vpop.f32.mrb[1].mxu1  ;;  %v271_v36 = vadd.f32 %v1461_v33, %v192_v32 }
 0x212   :  { %v266_v35 = vadd.f32 %v265_v34, %v192_v32 }
 0x214   :  { %1470 = vmatprep.mubr.msk.f32.mxu0 %vm100_vm0, %v266_v35 }
 0x215   :  { %1471 = vmatmul.mubr.msk.f32.vlgmr.msra.gmra.mrb[2].mxu0 %vm100_vm0, %v271_v36 }
 0x216   :  { %1495 = vmatprep.mubr.msk.f32.mxu0 %vm364_vm1, %v1921_v37 }
 0x2e8   :  { %v1472_v38 = vpop.f32.mrb[2].mxu0 }
 0x2e9   :  { %v351_v39 = vpop.f32.mrb[3].mxu0 }
 0x2ea   :  { %v1587_v40 = vpack.c.bf16 %v1472_v38, %v351_v39  ;;  %v694_v38 = vld [vmem:[#allocation7 + $0x80] sm:$0xff]  ;;  %v695_v39 = vld [vmem:[#allocation7 + $0x88] sm:$0xff] }
 0x2ec   :  { %1588 = vmatprep.subr.bf16.mxu1 %v1587_v40 }
 0x2ed   :  { %1590 = vmatpush3.bf16.msra.mxu1 %v1587_v40  ;;  %v696_v40 = vld [vmem:[#allocation7 + $0x90] sm:$0xff] }
 0x2ee   :  { %1592 = vmatprep.subr.bf16.mxu1 %v1591_v52 }
 0x2f0   :  { %1478 = vmatmul.mubr.msk.f32.vlgmr.msra.gmra.mrb[2].mxu1 %vm364_vm1, %v1927_v41 }
 0x2f1   :  { %1594 = vmatpush3.bf16.msra.mxu1 %v1591_v52 }
 0x2f2   :  { %1596 = vmatprep.subr.bf16.mxu1 %v1595_v55 }
 0x2f5   :  { %1598 = vmatpush3.bf16.msra.mxu1 %v1595_v55 }
 0x3c3   :  { %v1479_v44 = vpop.f32.mrb[2].mxu1 }
 0x3c4   :  { %v437_v45 = vpop.f32.mrb[3].mxu1  ;;  %v443_v47 = vadd.f32 %v1479_v44, %v363_v43  ;;  %v697_v44 = vld [vmem:[#allocation7 + $0x98] sm:$0xff] }
 0x3c5   :  { %v438_v46 = vadd.f32 %v437_v45, %v363_v43  ;;  %v1603_v43 = vpack.c.bf16 %v695_v39, %v694_v38  ;;  %v1607_v45 = vpack.c.bf16 %v697_v44, %v696_v40 }
 0x3c6   :  { %v453_v49 = vmul.f32 %v443_v47, %v443_v47 }
 0x3c7   :  { %446 = vadd.xlane.f32.xlu0 %v438_v46  ;;  %v452_v48 = vmul.f32 %v438_v46, %v438_v46 }
 0x3c9   :  { %454 = vadd.xlane.f32.xlu1 %v452_v48 }
 0x3cb   :  { %448 = vadd.xlane.f32.xlu0 %v443_v47 }
 0x3cd   :  { %456 = vadd.xlane.f32.xlu1 %v453_v49 }
 0x454   :  { %v447_v56 = vpop.xlane.xlu0 %446 }
 0x455   :  { %v450_v57 = vmul.f32 0.03125, %v447_v56 }
 0x456   :  { %v455_v58 = vpop.xlane.xlu1 %454 }
 0x457   :  { %v460_v59 = vmul.f32 %v450_v57, %v450_v57  ;;  %v458_v60 = vmul.f32 0.03125, %v455_v58  ;;  %v464_v8 = vsub.f32 %v438_v46, %v450_v57 }
 0x458   :  { %v449_v61 = vpop.xlane.xlu0 %448 }
 0x459   :  { %v462_v62 = vsub.f32 %v458_v60, %v460_v59  ;;  %v451_v63 = vmul.f32 0.03125, %v449_v61  ;;  %v679_v60 = vsub.s32 6, %v1905_v18  ;;  %v685_v61 = vsub.s32 7, %v1905_v18 }
 0x45a   :  { %v457_v0 = vpop.xlane.xlu1 %456 }
 0x45b   :  { %v466_v1 = vadd.f32 1e-05, %v462_v62  ;;  %v461_v2 = vmul.f32 %v451_v63, %v451_v63  ;;  %v459_v3 = vmul.f32 0.03125, %v457_v0  ;;  %v465_v13 = vsub.f32 %v443_v47, %v451_v63 }
 0x45c   :  { %v680_v63 = vrot.slane %v1908_v20, %v679_v60 }
 0x45d   :  { %1652 = vrsqrt.f32 %v466_v1  ;;  %v463_v4 = vsub.f32 %v459_v3, %v461_v2 }
 0x45f   :  { %v467_v5 = vadd.f32 1e-05, %v463_v4  ;;  %v686_v4 = vrot.slane %v1908_v20, %v685_v61 }
 0x461   :  { %1654 = vrsqrt.f32 %v467_v5 }
 0x467   :  { %v1653_v10 = vpop.eup %1652 }
 0x468   :  { %v470_v11 = vmul.f32 %v1653_v10, %v464_v8 }
 0x46a   :  { %v476_v14 = vmul.f32 %v475_v9, %v470_v11 }
 0x46b   :  { %v1655_v15 = vpop.eup %1654 }
 0x46c   :  { %v471_v16 = vmul.f32 %v1655_v15, %v465_v13  ;;  %v1943_v17 = vadd.f32 %v481_v12, %v476_v14 }
 0x46e   :  { %v477_v21 = vmul.f32 %v475_v9, %v471_v16  ;;  %v484_v22 = vmax.f32 %v1943_v17, 0.0  ;;  %v1987_v17 = vld [vmem:[#allocation9 + $0x8] sm:$0xff] }
 0x470   :  { %v1946_v23 = vadd.f32 %v481_v12, %v477_v21  ;;  %1488 = vmatprep.mubr.msk.f32.mxu1 %vm100_vm0, %v484_v22 }
 0x472   :  { %v485_v24 = vmax.f32 %v1946_v23, 0.0 }
 0x474   :  { %1489 = vmatmul.mubr.msk.f32.vlgmr.msra.gmra.mrb[4].mxu1 %vm100_vm0, %v485_v24 }
 0x475   :  { %1513 = vmatprep.mubr.msk.f32.mxu1 %vm364_vm1, %v1921_v37 }
 0x547   :  { %v1490_v25 = vpop.f32.mrb[4].mxu1 }
 0x548   :  { %v563_v26 = vpop.f32.mrb[5].mxu1 }
 0x549   :  { %v1599_v27 = vpack.c.bf16 %v1490_v25, %v563_v26 }
 0x54b   :  { %1600 = vmatprep.subr.bf16.mxu0 %v1599_v27 }
 0x54c   :  { %1602 = vmatpush3.bf16.msra.mxu0 %v1599_v27 }
 0x54d   :  { %1604 = vmatprep.subr.bf16.mxu0 %v1603_v43 }
 0x54f   :  { %1496 = vmatmul.mubr.msk.f32.vlgmr.msra.gmra.mrb[4].mxu0 %vm364_vm1, %v1927_v41 }
 0x550   :  { %1606 = vmatpush3.bf16.msra.mxu0 %v1603_v43 }
 0x551   :  { %1608 = vmatprep.subr.bf16.mxu0 %v1607_v45 }
 0x554   :  { %1610 = vmatpush3.bf16.msra.mxu0 %v1607_v45 }
 0x622   :  { %v1497_v30 = vpop.f32.mrb[4].mxu0 }
 0x623   :  { %v648_v32 = vadd.f32 %v1497_v30, %v575_v29  ;;  %v642_v33 = vpop.f32.mrb[5].mxu0  ;;  %v902_v30 = vld [vmem:[#allocation7 + $0xa8] sm:$0xff] }
 0x624   :  { %v643_v34 = vadd.f32 %v642_v33, %v575_v29  ;;  %v901_v29 = vld [vmem:[#allocation7 + $0xa0] sm:$0xff] }
 0x625   :  { %653 = vadd.xlane.f32.xlu1 %v648_v32  ;;  %v658_v35 = vmul.f32 %v648_v32, %v648_v32  ;;  %v1615_v33 = vpack.c.bf16 %v902_v30, %v901_v29 }
 0x626   :  { %651 = vadd.xlane.f32.xlu0 %v643_v34  ;;  %v657_v36 = vmul.f32 %v643_v34, %v643_v34 }
 0x629   :  { %661 = vadd.xlane.f32.xlu1 %v658_v35 }
 0x62a   :  { %659 = vadd.xlane.f32.xlu0 %v657_v36 }
 0x6b2   :  { %v654_v46 = vpop.xlane.xlu1 %653 }
 0x6b3   :  { %v656_v47 = vmul.f32 0.03125, %v654_v46  ;;  %v652_v48 = vpop.xlane.xlu0 %651 }
 0x6b4   :  { %v655_v49 = vmul.f32 0.03125, %v652_v48 }
 0x6b5   :  { %v666_v51 = vmul.f32 %v656_v47, %v656_v47  ;;  %v670_v62 = vsub.f32 %v648_v32, %v656_v47  ;;  %v903_v32 = vld [vmem:[#allocation7 + $0xb0] sm:$0xff] }
 0x6b6   :  { %v662_v50 = vpop.xlane.xlu1 %661  ;;  %v665_v54 = vmul.f32 %v655_v49, %v655_v49  ;;  %v669_v1 = vsub.f32 %v643_v34, %v655_v49  ;;  %v904_v34 = vld [vmem:[#allocation7 + $0xb8] sm:$0xff] }
 0x6b7   :  { %v664_v52 = vmul.f32 0.03125, %v662_v50  ;;  %v660_v53 = vpop.xlane.xlu0 %659  ;;  %v1619_v35 = vpack.c.bf16 %v904_v34, %v903_v32 }
 0x6b8   :  { %v663_v55 = vmul.f32 0.03125, %v660_v53 }
 0x6b9   :  { %v668_v56 = vsub.f32 %v664_v52, %v666_v51  ;;  %v887_v52 = vrot.slane %v1987_v17, %v191_v31 }
 0x6ba   :  { %v667_v57 = vsub.f32 %v663_v55, %v665_v54 }
 0x6bb   :  { %v672_v58 = vadd.f32 1e-05, %v668_v56 }
 0x6bc   :  { %v671_v59 = vadd.f32 1e-05, %v667_v57  ;;  %v893_v57 = vrot.slane %v1987_v17, %v362_v42  ;;  %v989_v42 = vrot.slane %v1987_v17, %v474_v6  ;;  %v1181_v6 = vld [vmem:[#allocation7 + $0xc8] sm:$0xff] }
 0x6bd   :  { %1656 = vrsqrt.f32 %v672_v58 }
 0x6be   :  { %1658 = vrsqrt.f32 %v671_v59 }
 0x6c7   :  { %v1657_v0 = vpop.eup %1656 }
 0x6c8   :  { %v1659_v2 = vpop.eup %1658  ;;  %v676_v3 = vmul.f32 %v1657_v0, %v670_v62 }
 0x6c9   :  { %v675_v5 = vmul.f32 %v1659_v2, %v669_v1 }
 0x6ca   :  { %v682_v8 = vmul.f32 %v680_v63, %v676_v3 }
 0x6cb   :  { %v681_v9 = vmul.f32 %v680_v63, %v675_v5 }
 0x6cc   :  { %v688_v10 = vadd.f32 %v686_v4, %v682_v8 }
 0x6cd   :  { %v687_v11 = vadd.f32 %v686_v4, %v681_v9 }
 0x6ce   :  { %v690_v12 = vmax.f32 %v688_v10, 0.0 }
 0x6cf   :  { %v689_v13 = vmax.f32 %v687_v11, 0.0 }
 0x6d0   :  { %v1977_v15 = vadd.f32 %v690_v12, %v485_v24 }
 0x6d1   :  { %v1973_v14 = vadd.f32 %v689_v13, %v484_v22  ;;  %v782_v22 = vrot.slane %v1987_v17, %v98_v19 }
 0x6d3   :  { %1506 = vmatprep.mubr.msk.f32.mxu0 %vm100_vm0, %v1973_v14 }
 0x6d4   :  { %1507 = vmatmul.mubr.msk.f32.vlgmr.msra.gmra.mrb[6].mxu0 %vm100_vm0, %v1977_v15 }
 0x6d5   :  { %1531 = vmatprep.mubr.msk.f32.mxu0 %vm364_vm1, %v1921_v37 }
 0x7a7   :  { %v1508_v20 = vpop.f32.mrb[6].mxu0 }
 0x7a8   :  { %v770_v16 = vpop.f32.mrb[7].mxu0 }
 0x7a9   :  { %v1611_v21 = vpack.c.bf16 %v1508_v20, %v770_v16  ;;  %v1791_v20 = vmov 0.0|0.0   ;;  %v1793_v16 = vmov 0.0  }
 0x7ab   :  { %1612 = vmatprep.subr.bf16.mxu1 %v1611_v21 }
 0x7ac   :  { %1614 = vmatpush3.bf16.msra.mxu1 %v1611_v21  ;;  %v1182_v21 = vld [vmem:[#allocation7 + $0xd0] sm:$0xff] }
 0x7ad   :  { %1616 = vmatprep.subr.bf16.mxu1 %v1615_v33 }
 0x7af   :  { %1514 = vmatmul.mubr.msk.f32.vlgmr.msra.gmra.mrb[6].mxu1 %vm364_vm1, %v1927_v41 }
 0x7b0   :  { %1618 = vmatpush3.bf16.msra.mxu1 %v1615_v33 }
 0x7b1   :  { %1620 = vmatprep.subr.bf16.mxu1 %v1619_v35 }
 0x7b4   :  { %1622 = vmatpush3.bf16.msra.mxu1 %v1619_v35 }
 0x7b5   :  { %1630 = vmatprep.subr.bf16.mxu1 %v1791_v20 }
 0x882   :  { %v1515_v23 = vpop.f32.mrb[6].mxu1 }
 0x883   :  { %v855_v24 = vadd.f32 %v1515_v23, %v782_v22  ;;  %v849_v25 = vpop.f32.mrb[7].mxu1  ;;  %v1183_v23 = vld [vmem:[#allocation7 + $0xd8] sm:$0xff] }
 0x884   :  { %v850_v26 = vadd.f32 %v849_v25, %v782_v22 }
 0x885   :  { %860 = vadd.xlane.f32.xlu1 %v855_v24  ;;  %v865_v37 = vmul.f32 %v855_v24, %v855_v24 }
 0x886   :  { %858 = vadd.xlane.f32.xlu0 %v850_v26  ;;  %v864_v27 = vmul.f32 %v850_v26, %v850_v26 }
 0x889   :  { %868 = vadd.xlane.f32.xlu1 %v865_v37 }
 0x88a   :  { %866 = vadd.xlane.f32.xlu0 %v864_v27 }
 0x912   :  { %v861_v19 = vpop.xlane.xlu1 %860 }
 0x913   :  { %v863_v36 = vmul.f32 0.03125, %v861_v19  ;;  %v859_v38 = vpop.xlane.xlu0 %858 }
 0x914   :  { %v862_v39 = vmul.f32 0.03125, %v859_v38 }
 0x915   :  { %v873_v43 = vmul.f32 %v863_v36, %v863_v36  ;;  %v877_v53 = vsub.f32 %v855_v24, %v863_v36  ;;  %v1634_v24 = vpack.c.bf16 %v1183_v23, %v1182_v21 }
 0x916   :  { %v869_v40 = vpop.xlane.xlu1 %868  ;;  %v872_v46 = vmul.f32 %v862_v39, %v862_v39  ;;  %v876_v55 = vsub.f32 %v850_v26, %v862_v39 }
 0x917   :  { %v871_v44 = vmul.f32 0.03125, %v869_v40  ;;  %v867_v45 = vpop.xlane.xlu0 %866 }
 0x918   :  { %v870_v47 = vmul.f32 0.03125, %v867_v45 }
 0x919   :  { %v875_v48 = vsub.f32 %v871_v44, %v873_v43  ;;  %v1094_v43 = vrot.slane %v1987_v17, %v480_v7  ;;  %v1263_v7 = vld [vmem:[#allocation7 + $0xe0] sm:$0xff] }
 0x91a   :  { %v874_v49 = vsub.f32 %v870_v47, %v872_v46  ;;  %v1100_v47 = vrot.slane %v1987_v17, %v574_v28 }
 0x91b   :  { %v879_v50 = vadd.f32 1e-05, %v875_v48 }
 0x91c   :  { %v878_v51 = vadd.f32 1e-05, %v874_v49 }
 0x91d   :  { %1660 = vrsqrt.f32 %v879_v50 }
 0x91e   :  { %1662 = vrsqrt.f32 %v878_v51 }
 0x927   :  { %v1661_v54 = vpop.eup %1660 }
 0x928   :  { %v1663_v56 = vpop.eup %1662  ;;  %v883_v58 = vmul.f32 %v1661_v54, %v877_v53 }
 0x929   :  { %v882_v59 = vmul.f32 %v1663_v56, %v876_v55 }
 0x92a   :  { %v889_v62 = vmul.f32 %v887_v52, %v883_v58  ;;  %v1264_v58 = vld [vmem:[#allocation7 + $0xe8] sm:$0xff] }
 0x92b   :  { %v888_v63 = vmul.f32 %v887_v52, %v882_v59  ;;  %v1637_v59 = vpack.c.bf16 %v1264_v58, %v1263_v7 }
 0x92c   :  { %v895_v0 = vadd.f32 %v893_v57, %v889_v62 }
 0x92d   :  { %v894_v1 = vadd.f32 %v893_v57, %v888_v63  ;;  %v1105_v57 = vld [vmem:[#allocation6] sm:$0xff]  ;;  %v1265_v63 = vld [vmem:[#allocation7 + $0xf0] sm:$0xff] }
 0x92e   :  { %v897_v2 = vmax.f32 %v895_v0, 0.0  ;;  %v1266_v0 = vld [vmem:[#allocation7 + $0xf8] sm:$0xff] }
 0x92f   :  { %v896_v3 = vmax.f32 %v894_v1, 0.0  ;;  %v1640_v1 = vpack.c.bf16 %v1266_v0, %v1265_v63 }
 0x930   :  { %v899_v31 = vadd.f32 %v897_v2, %v1977_v15  ;;  %v1187_v2 = vrot.slane %v1987_v17, %v679_v60 }
 0x931   :  { %v898_v4 = vadd.f32 %v896_v3, %v1973_v14 }
 0x933   :  { %1524 = vmatprep.mubr.msk.f32.mxu1 %vm100_vm0, %v898_v4 }
 0x934   :  { %1525 = vmatmul.mubr.msk.f32.vlgmr.msra.gmra.mrb[8].mxu1 %vm100_vm0, %v899_v31 }
 0x935   :  { %1549 = vmatprep.mubr.msk.f32.mxu1 %vm1792_vm2, %v1793_v16 }
 0xa07   :  { %v1526_v5 = vpop.f32.mrb[8].mxu1 }
 0xa08   :  { %v977_v8 = vpop.f32.mrb[9].mxu1 }
 0xa09   :  { %v1623_v9 = vpack.c.bf16 %v1526_v5, %v977_v8  ;;  %v1270_v8 = vrot.slane %v1987_v17, %v685_v61 }
 0xa0b   :  { %1624 = vmatprep.subr.bf16.mxu0 %v1623_v9 }
 0xa0c   :  { %1626 = vmatpush3.bf16.msra.mxu0 %v1623_v9 }
 0xa0d   :  { %1627 = vmatprep.subr.bf16.mxu0 %v1791_v20 }
 0xa0f   :  { %1532 = vmatmul.mubr.msk.f32.vlgmr.msra.gmra.mrb[8].mxu0 %vm364_vm1, %v1927_v41  ;;  %v1180_v41 = vld [vmem:[#allocation7 + $0xc0] sm:$0xff] }
 0xa10   :  { %1538 = vmatprep.mubr.msk.f32.mxu0 %vm1792_vm2, %v1793_v16  ;;  %v1631_v22 = vpack.c.bf16 %v1181_v6, %v1180_v41 }
 0xa12   :  { %1632 = vmatpush3.bf16.msra.mxu1 %v1631_v22 }
 0xa13   :  { %1633 = vmatprep.subr.bf16.mxu1 %v1791_v20 }
 0xa16   :  { %1635 = vmatpush3.bf16.msra.mxu1 %v1634_v24 }
 0xae2   :  { %v1533_v10 = vpop.f32.mrb[8].mxu0 }
 0xae3   :  { %v1062_v11 = vadd.f32 %v1533_v10, %v989_v42  ;;  %v1056_v12 = vpop.f32.mrb[9].mxu0 }
 0xae4   :  { %v1057_v13 = vadd.f32 %v1056_v12, %v989_v42 }
 0xae5   :  { %1067 = vadd.xlane.f32.xlu1 %v1062_v11  ;;  %v1072_v14 = vmul.f32 %v1062_v11, %v1062_v11 }
 0xae6   :  { %1065 = vadd.xlane.f32.xlu0 %v1057_v13  ;;  %v1071_v15 = vmul.f32 %v1057_v13, %v1057_v13 }
 0xae9   :  { %1075 = vadd.xlane.f32.xlu1 %v1072_v14 }
 0xaea   :  { %1073 = vadd.xlane.f32.xlu0 %v1071_v15 }
 0xb72   :  { %v1068_v25 = vpop.xlane.xlu1 %1067 }
 0xb73   :  { %v1070_v26 = vmul.f32 0.03125, %v1068_v25  ;;  %v1066_v37 = vpop.xlane.xlu0 %1065 }
 0xb74   :  { %v1069_v27 = vmul.f32 0.03125, %v1066_v37 }
 0xb75   :  { %v1080_v30 = vmul.f32 %v1070_v26, %v1070_v26  ;;  %v1084_v40 = vsub.f32 %v1062_v11, %v1070_v26 }
 0xb76   :  { %v1076_v29 = vpop.xlane.xlu1 %1075  ;;  %v1079_v34 = vmul.f32 %v1069_v27, %v1069_v27  ;;  %v1083_v45 = vsub.f32 %v1057_v13, %v1069_v27 }
 0xb77   :  { %v1078_v32 = vmul.f32 0.03125, %v1076_v29  ;;  %v1074_v33 = vpop.xlane.xlu0 %1073 }
 0xb78   :  { %v1077_v35 = vmul.f32 0.03125, %v1074_v33 }
 0xb79   :  { %v1082_v19 = vsub.f32 %v1078_v32, %v1080_v30 }
 0xb7a   :  { %v1081_v36 = vsub.f32 %v1077_v35, %v1079_v34 }
 0xb7b   :  { %v1086_v38 = vadd.f32 1e-05, %v1082_v19 }
 0xb7c   :  { %v1085_v39 = vadd.f32 1e-05, %v1081_v36 }
 0xb7d   :  { %1664 = vrsqrt.f32 %v1086_v38 }
 0xb7e   :  { %1666 = vrsqrt.f32 %v1085_v39 }
 0xb87   :  { %v1665_v44 = vpop.eup %1664 }
 0xb88   :  { %v1667_v46 = vpop.eup %1666  ;;  %v1090_v48 = vmul.f32 %v1665_v44, %v1084_v40 }
 0xb89   :  { %v1089_v49 = vmul.f32 %v1667_v46, %v1083_v45 }
 0xb8a   :  { %v1096_v50 = vmul.f32 %v1094_v43, %v1090_v48 }
 0xb8b   :  { %v1095_v51 = vmul.f32 %v1094_v43, %v1089_v49 }
 0xb8c   :  { %v1102_v52 = vadd.f32 %v1100_v47, %v1096_v50 }
 0xb8d   :  { %v1101_v53 = vadd.f32 %v1100_v47, %v1095_v51 }
 0xb8e   :  { %v1104_v54 = vmax.f32 %v1102_v52, 0.0 }
 0xb8f   :  { %v1103_v55 = vmax.f32 %v1101_v53, 0.0 }
 0xb91   :  { %v1628_v56 = vpack.c.bf16 %v1104_v54, %v1103_v55 }
 0xb93   :  { %1629 = vmatpush3.bf16.msra.mxu0 %v1628_v56 }
 0xb94   :  { %1636 = vmatprep.subr.bf16.mxu0 %v1791_v20 }
 0xb96   :  { %1539 = vmatmul.mubr.msk.f32.vlgmr.msra.gmra.mrb[10].mxu0 %vm364_vm1, %v1105_v57 }
 0xb97   :  { %1560 = vmatprep.mubr.msk.f32.mxu0 %vm1792_vm2, %v1793_v16  ;;  %1638 = vmatpush3.bf16.msra.mxu0 %v1637_v59 }
 0xb98   :  { %1639 = vmatprep.subr.bf16.mxu0 %v1791_v20 }
 0xb9b   :  { %1641 = vmatpush3.bf16.msra.mxu0 %v1640_v1 }
 0xc69   :  { %v1175_v28 = vpop.f32.mrb[10].mxu0 }
 0xc6a   :  { %v1540_v62 = vpop.f32.mrb[11].mxu0  ;;  %1550 = vmatmul.mubr.msk.f32.vlgmr.msra.gmra.mrb[10].mxu1 %vm100_vm0, %v1175_v28 }
 0xd3d   :  { %v1257_v3 = vpop.f32.mrb[10].mxu1 }
 0xd3e   :  { %v1258_v4 = vadd.f32 %v1257_v3, %v1187_v2  ;;  %v1551_v31 = vpop.f32.mrb[11].mxu1 }
 0xd40   :  { %v1261_v5 = vmax.f32 %v1258_v4, 0.0 }
 0xd42   :  { %1561 = vmatmul.mubr.msk.f32.vlgmr.msra.gmra.mrb[12].mxu0 %vm100_vm0, %v1261_v5 }
 0xe15   :  { %v1340_v9 = vpop.f32.mrb[12].mxu0 }
 0xe16   :  { %v1341_v42 = vadd.f32 %v1340_v9, %v1270_v8  ;;  %v1562_v10 = vpop.f32.mrb[13].mxu0 }
 0xe18   :  { %1344 = vst [vmem:[%s2033_s5] sm:$0xff] %v1341_v42 }
 0xe19   :  { %1349 = vsyncpa [#allocation3], 1 }
 0xe1a   :  { %1350 = vsyncpa [#allocation5], 1 }
 0xe1b   :  { %1351 = vsyncpa [#allocation8], 1 }

</bundles_post_ra>
